<compile_context>
chip_gen: v6e
topology: v6e:2x2x1
jax: 0.10.0
libtpu: 0.0.40
codegen_flags: <defaults>
</compile_context>

<pallas_src>
import math
import functools

import jax
import jax.numpy as jnp
from jax import lax
from jax.experimental import pallas as pl
from jax.experimental.pallas import tpu as pltpu


def _round_up(x, m):
    return ((x + m - 1) // m) * m


# --------------------------------------------------------------------------
# Kernel 1: K/V projection — full-width bf16 matmuls, done ONCE per (b, tile).
# --------------------------------------------------------------------------
def _kv_project_kernel(k_ref, v_ref, wk_ref, bk_ref, wv_ref, bv_ref,
                       kp_ref, vp_ref):
    """k_ref/v_ref: (1, TS, D) f32; w*: (D, D) bf16; b*: (1, D) f32."""
    k_in = k_ref[0].astype(jnp.bfloat16)                              # (TS, D)
    v_in = v_ref[0].astype(jnp.bfloat16)
    kp = jnp.dot(k_in, wk_ref[...], preferred_element_type=jnp.float32) + bk_ref[...]
    vp = jnp.dot(v_in, wv_ref[...], preferred_element_type=jnp.float32) + bv_ref[...]
    kp_ref[0] = kp.astype(kp_ref.dtype)                               # bf16 out
    vp_ref[0] = vp.astype(vp_ref.dtype)


# --------------------------------------------------------------------------
# Kernel 2: fused Q projection + per-head attention + single Wo projection.
# --------------------------------------------------------------------------
def _attention_kernel(q_ref, kp_ref, vp_ref, mask_ref,
                      wq_ref, bq_ref, wo_ref, bo_ref,
                      o_ref, heads_ref, *, num_heads):
    """One (batch, query-tile) grid step.

    q_ref    : (1, TQ, D) f32   raw query tile
    kp_ref   : (1, S, D)  bf16  pre-projected keys   (qi-invariant)
    vp_ref   : (1, S, D)  bf16  pre-projected values (qi-invariant)
    mask_ref : (1, TQ, S) int8  (0 == masked)
    wq/wo    : (D, D) bf16, bq/bo: (1, D) f32   grid-invariant
    o_ref    : (1, TQ, D)
    heads_ref: (TQ, D) f32 VMEM scratch — staged concat of head outputs
    """
    q_in = q_ref[0]                                                   # (TQ, D) f32
    d_model = q_in.shape[-1]
    d_k = d_model // num_heads
    scale = jnp.float32(1.0 / math.sqrt(d_k))

    # Full-width Q projection (bf16 operands, f32 acc).  The 1/sqrt(d_k)
    # scale is folded into qp BEFORE the bf16 cast (TQ*D muls, not TQ*S/head).
    qp = jnp.dot(q_in.astype(jnp.bfloat16), wq_ref[...],
                 preferred_element_type=jnp.float32) + bq_ref[...]
    qp = (qp * scale).astype(jnp.bfloat16)                            # (TQ, D)

    k_all = kp_ref[0]                                                 # (S, D) bf16
    v_all = vp_ref[0]                                                 # (S, D) bf16

    # Mask bias computed once, hoisted out of the head loop (f32, v5e-safe).
    mask_bias = jnp.where(mask_ref[0] == 0,
                          jnp.float32(-1e9), jnp.float32(0.0))        # (TQ, S)

    # TODO(synk): for d_k < 128 the lane slices below are not 128-aligned;
    # for production d_k pad heads to 128 lanes or batch heads per MXU call.
    for h in range(num_heads):
        lo = h * d_k
        hi = lo + d_k
        qh = qp[:, lo:hi]                                             # (TQ, d_k) bf16
        kh = k_all[:, lo:hi]                                          # (S,  d_k) bf16
        vh = v_all[:, lo:hi]                                          # (S,  d_k) bf16

        # scores = (q/sqrt(d_k)) @ k^T: contract last dims directly (no kh.T).
        scores = lax.dot_general(
            qh, kh, dimension_numbers=(((1,), (1,)), ((), ())),
            preferred_element_type=jnp.float32)                       # (TQ, S)
        scores = scores + mask_bias

        # Numerically stable softmax in f32; divide goes to the EUP slot.
        scores = scores - jnp.max(scores, axis=-1, keepdims=True)
        probs = jnp.exp(scores)
        probs = probs * pl.reciprocal(jnp.sum(probs, axis=-1, keepdims=True),
                                      approx=True)

        head_out = jnp.dot(probs.astype(jnp.bfloat16), vh,
                           preferred_element_type=jnp.float32)        # (TQ, d_k)

        # Stage this head's output into its column slice of the concat scratch.
        heads_ref[:, lo:hi] = head_out

    # Single full-depth output projection + bias (one MXU pass over D).
    out = jnp.dot(heads_ref[...].astype(jnp.bfloat16), wo_ref[...],
                  preferred_element_type=jnp.float32) + bo_ref[...]
    o_ref[0] = out.astype(o_ref.dtype)


# --------------------------------------------------------------------------
# Wrapper
# --------------------------------------------------------------------------
def multi_head_attention(query, key, value, params, *, num_heads, mask=None,
                         q_tile=128, vmem_limit_bytes=None):
    """query/key/value: [B, S, D]; mask: [B, S, S] (0 == masked) or None.

    q_tile: 128 is a good default for v5e/v7x; bump to 256 on v6e when VMEM
    allows (fills the 256-wide MXU M dimension and halves per-step overhead).
    """
    B, S, D = query.shape
    assert D % num_heads == 0

    # ---- query-tile selection + sequence padding (no silent TQ=S fallback) --
    TQ = q_tile if S >= q_tile else _round_up(S, 8)
    S_pad = _round_up(S, TQ)
    n_q = S_pad // TQ

    # int8 mask: 4x less HBM DMA than f32; semantics identical (==0 test).
    if mask is None:
        base_mask = jnp.ones((B, S, S), dtype=jnp.int8)
    else:
        base_mask = (mask != 0).astype(jnp.int8)
    if S_pad != S:
        pad_sd = ((0, 0), (0, S_pad - S), (0, 0))
        query = jnp.pad(query, pad_sd)
        key = jnp.pad(key, pad_sd)
        value = jnp.pad(value, pad_sd)
        # Padded key columns stay 0 (→ -1e9 bias); padded query rows are
        # sliced off the output below.
        mask_i8 = jnp.zeros((B, S_pad, S_pad), jnp.int8).at[:, :S, :S].set(base_mask)
    else:
        mask_i8 = base_mask

    wq, bq, wk, bk, wv, bv, wo, bo = params                 # w*: (D, D), b*: (1, D)
    # bf16 weights host-side: full-rate MXU, half the weight VMEM / HBM DMA.
    wq_b, wk_b, wv_b, wo_b = (w.astype(jnp.bfloat16) for w in (wq, wk, wv, wo))
    # Biases stay f32 (added to the f32 accumulator).

    # Shared grid-invariant specs (both grids are (B, n_q)).
    w_spec = pl.BlockSpec((D, D), lambda b, i: (0, 0))
    b_spec = pl.BlockSpec((1, D), lambda b, i: (0, 0))
    # TODO(synk): for large D / very long S, mark the (b,·)-invariant K/V and
    # weight specs pipeline_mode=pl.Buffered(1) (single-buffer) and/or add an
    # innermost "arbitrary" KV grid axis with online softmax (flash-style) to
    # bound resident VMEM on v7x's 64 MiB.

    # ---- kernel 1: project K and V once per batch, store bf16 in HBM -------
    kv_in_spec = pl.BlockSpec((1, TQ, D), lambda b, si: (b, si, 0))
    kv_out_spec = pl.BlockSpec((1, TQ, D), lambda b, si: (b, si, 0))
    k_proj, v_proj = pl.pallas_call(
        _kv_project_kernel,
        out_shape=(jax.ShapeDtypeStruct((B, S_pad, D), jnp.bfloat16),
                   jax.ShapeDtypeStruct((B, S_pad, D), jnp.bfloat16)),
        grid_spec=pltpu.PrefetchScalarGridSpec(
            num_scalar_prefetch=0,
            grid=(B, n_q),
            in_specs=[kv_in_spec, kv_in_spec, w_spec, b_spec, w_spec, b_spec],
            out_specs=[kv_out_spec, kv_out_spec],
        ),
        compiler_params=pltpu.CompilerParams(
            dimension_semantics=("parallel", "parallel")),
    )(key, value, wk_b, bk, wv_b, bv)

    # ---- kernel 2: fused Q projection + attention + Wo ---------------------
    q_spec = pl.BlockSpec((1, TQ, D), lambda b, qi: (b, qi, 0))
    kv_spec = pl.BlockSpec((1, S_pad, D), lambda b, qi: (b, 0, 0))   # qi-invariant
    mask_spec = pl.BlockSpec((1, TQ, S_pad), lambda b, qi: (b, qi, 0))
    o_spec = pl.BlockSpec((1, TQ, D), lambda b, qi: (b, qi, 0))

    if vmem_limit_bytes is None:
        # Rough resident-set estimate (double-buffered tiles + weights + live
        # intermediates); raise the scoped limit only when it would not fit
        # the smallest default (v5e: 16 MiB scoped).
        est = (2 * 2 * (TQ * D * 4)            # q tile + out tile (dbl-buffered)
               + 2 * (TQ * S_pad)              # int8 mask (dbl-buffered)
               + 2 * 2 * (S_pad * D * 2)       # bf16 K/V (dbl-buffered)
               + 2 * 2 * (D * D * 2)           # bf16 Wq/Wo (dbl-buffered)
               + TQ * D * 4                    # heads scratch
               + 2 * TQ * S_pad * 4 + 2 * TQ * D * 4)   # live intermediates
        if est > 12 * 1024 * 1024:
            vmem_limit_bytes = min(int(est * 3 // 2), 96 * 1024 * 1024)

    kernel = functools.partial(_attention_kernel, num_heads=num_heads)
    out = pl.pallas_call(
        kernel,
        out_shape=jax.ShapeDtypeStruct((B, S_pad, D), query.dtype),
        grid_spec=pltpu.PrefetchScalarGridSpec(
            num_scalar_prefetch=0,
            grid=(B, n_q),
            in_specs=[q_spec, kv_spec, kv_spec, mask_spec,
                      w_spec, b_spec, w_spec, b_spec],
            out_specs=o_spec,
            scratch_shapes=[pltpu.VMEM((TQ, D), jnp.float32)],
        ),
        compiler_params=pltpu.CompilerParams(
            dimension_semantics=("parallel", "parallel"),
            vmem_limit_bytes=vmem_limit_bytes),
    )(query, k_proj, v_proj, mask_i8, wq_b, bq, wo_b, bo)

    return out[:, :S, :] if S_pad != S else out


# --------------------------------------------------------------------------
# Plain-JAX f32 reference mirroring the PyTorch forward (for verification).
# --------------------------------------------------------------------------
def _reference_mha(query, key, value, params, *, num_heads, mask=None):
    wq, bq, wk, bk, wv, bv, wo, bo = params
    B, S, D = query.shape
    d_k = D // num_heads

    def transform(x, w, b):
        out = x @ w + b                               # (B, S, D)
        out = out.reshape(B, S, num_heads, d_k)
        return out.transpose(0, 2, 1, 3)              # (B, h, S, d_k)

    q = transform(query, wq, bq)
    k = transform(key, wk, bk)
    v = transform(value, wv, bv)

    scores = jnp.einsum("bhqd,bhkd->bhqk", q, k) / math.sqrt(d_k)
    if mask is not None:
        scores = jnp.where(mask[:, None, :, :] == 0, -1e9, scores)
    probs = jax.nn.softmax(scores, axis=-1)
    out = jnp.einsum("bhqk,bhkd->bhqd", probs, v)
    out = out.transpose(0, 2, 1, 3).reshape(B, S, D)
    return out @ wo + bo


if __name__ == "__main__":
    # Small shapes consistent with the module: d_model=32, h=4, seq=8, batch=2.
    B, S, D, H = 2, 8, 32, 4
    key0 = jax.random.PRNGKey(0)
    ks = jax.random.split(key0, 12)

    query = jax.random.normal(ks[0], (B, S, D), dtype=jnp.float32)
    key_in = jax.random.normal(ks[1], (B, S, D), dtype=jnp.float32)
    value = jax.random.normal(ks[2], (B, S, D), dtype=jnp.float32)

    scale = 1.0 / math.sqrt(D)
    params = (
        jax.random.uniform(ks[3], (D, D), minval=-scale, maxval=scale),   # wq
        jax.random.uniform(ks[4], (1, D), minval=-scale, maxval=scale),   # bq
        jax.random.uniform(ks[5], (D, D), minval=-scale, maxval=scale),   # wk
        jax.random.uniform(ks[6], (1, D), minval=-scale, maxval=scale),   # bk
        jax.random.uniform(ks[7], (D, D), minval=-scale, maxval=scale),   # wv
        jax.random.uniform(ks[8], (1, D), minval=-scale, maxval=scale),   # bv
        jax.random.uniform(ks[9], (D, D), minval=-scale, maxval=scale),   # wo
        jax.random.uniform(ks[10], (1, D), minval=-scale, maxval=scale),  # bo
    )

    # Causal mask to exercise the masked_fill path.
    causal = jnp.tril(jnp.ones((S, S), dtype=jnp.float32))
    mask = jnp.broadcast_to(causal, (B, S, S))

    out = multi_head_attention(query, key_in, value, params,
                               num_heads=H, mask=mask)
    out = jax.block_until_ready(out)

    ref = _reference_mha(query, key_in, value, params, num_heads=H, mask=mask)
    assert out.shape == (B, S, D)
    # bf16 MXU operands (f32 accumulation) + approx reciprocal → relaxed f32
    # tolerance; a structural bug would blow far past this.
    assert jnp.allclose(out, ref, atol=3e-2, rtol=3e-2), "mismatch vs reference"

    print("KERNEL_OK")
</pallas_src>

<mosaic_0001>
module attributes {stable_mosaic.version = 11 : i64} {
  func.func @_kv_project_kernel(%arg0: i32, %arg1: i32, %arg2: memref<1x8x32xf32, #tpu.memory_space<vmem>>, %arg3: memref<1x8x32xf32, #tpu.memory_space<vmem>>, %arg4: memref<32x32xbf16, #tpu.memory_space<vmem>>, %arg5: memref<1x32xf32, #tpu.memory_space<vmem>>, %arg6: memref<32x32xbf16, #tpu.memory_space<vmem>>, %arg7: memref<1x32xf32, #tpu.memory_space<vmem>>, %arg8: memref<1x8x32xbf16, #tpu.memory_space<vmem>>, %arg9: memref<1x8x32xbf16, #tpu.memory_space<vmem>>) attributes {dimension_semantics = [#tpu.dimension_semantics<parallel>, #tpu.dimension_semantics<parallel>], iteration_bounds = array<i64: 2, 1>, scalar_prefetch = 0 : i64, scratch_operands = 0 : i64, tpu.core_type = #tpu.core_type<tc>, window_params = [{transform_indices = @transform_0, window_bounds = array<i64: 1, 8, 32>}, {transform_indices = @transform_1, window_bounds = array<i64: 1, 8, 32>}, {pipeline_mode = #tpu.pipeline_mode<synchronous>, transform_indices = @transform_2, window_bounds = array<i64: 32, 32>}, {pipeline_mode = #tpu.pipeline_mode<synchronous>, transform_indices = @transform_3, window_bounds = array<i64: 1, 32>}, {pipeline_mode = #tpu.pipeline_mode<synchronous>, transform_indices = @transform_4, window_bounds = array<i64: 32, 32>}, {pipeline_mode = #tpu.pipeline_mode<synchronous>, transform_indices = @transform_5, window_bounds = array<i64: 1, 32>}, {transform_indices = @transform_6, window_bounds = array<i64: 1, 8, 32>}, {transform_indices = @transform_7, window_bounds = array<i64: 1, 8, 32>}]} {
    %c0 = arith.constant 0 : index
    %c0_0 = arith.constant 0 : index
    %c0_1 = arith.constant 0 : index
    %0 = vector.load %arg2[%c0, %c0_0, %c0_1] : memref<1x8x32xf32, #tpu.memory_space<vmem>>, vector<1x8x32xf32>
    %1 = vector.shape_cast %0 : vector<1x8x32xf32> to vector<8x32xf32>
    %2 = arith.truncf %1 : vector<8x32xf32> to vector<8x32xbf16>
    %c0_2 = arith.constant 0 : index
    %c0_3 = arith.constant 0 : index
    %c0_4 = arith.constant 0 : index
    %3 = vector.load %arg3[%c0_2, %c0_3, %c0_4] : memref<1x8x32xf32, #tpu.memory_space<vmem>>, vector<1x8x32xf32>
    %4 = vector.shape_cast %3 : vector<1x8x32xf32> to vector<8x32xf32>
    %5 = arith.truncf %4 : vector<8x32xf32> to vector<8x32xbf16>
    %c0_5 = arith.constant 0 : index
    %c0_6 = arith.constant 0 : index
    %6 = vector.load %arg4[%c0_5, %c0_6] : memref<32x32xbf16, #tpu.memory_space<vmem>>, vector<32x32xbf16>
    %cst = arith.constant dense<0.000000e+00> : vector<8x32xf32>
    %7 = tpu.matmul %2, %6, %cst {dimension_numbers = #tpu.dot_dimension_numbers<[1], [0], [0], [1], [0, 0, 1, 1], [], []>} : vector<8x32xbf16>, vector<32x32xbf16>, vector<8x32xf32> -> vector<8x32xf32>
    %c0_7 = arith.constant 0 : index
    %c0_8 = arith.constant 0 : index
    %8 = vector.load %arg5[%c0_7, %c0_8] : memref<1x32xf32, #tpu.memory_space<vmem>>, vector<1x32xf32>
    %9 = vector.broadcast %8 : vector<1x32xf32> to vector<8x32xf32>
    %10 = arith.addf %7, %9 : vector<8x32xf32>
    %c0_9 = arith.constant 0 : index
    %c0_10 = arith.constant 0 : index
    %11 = vector.load %arg6[%c0_9, %c0_10] : memref<32x32xbf16, #tpu.memory_space<vmem>>, vector<32x32xbf16>
    %cst_11 = arith.constant dense<0.000000e+00> : vector<8x32xf32>
    %12 = tpu.matmul %5, %11, %cst_11 {dimension_numbers = #tpu.dot_dimension_numbers<[1], [0], [0], [1], [0, 0, 1, 1], [], []>} : vector<8x32xbf16>, vector<32x32xbf16>, vector<8x32xf32> -> vector<8x32xf32>
    %c0_12 = arith.constant 0 : index
    %c0_13 = arith.constant 0 : index
    %13 = vector.load %arg7[%c0_12, %c0_13] : memref<1x32xf32, #tpu.memory_space<vmem>>, vector<1x32xf32>
    %14 = vector.broadcast %13 : vector<1x32xf32> to vector<8x32xf32>
    %15 = arith.addf %12, %14 : vector<8x32xf32>
    %16 = arith.truncf %10 : vector<8x32xf32> to vector<8x32xbf16>
    %c0_14 = arith.constant 0 : index
    %c0_15 = arith.constant 0 : index
    %c0_16 = arith.constant 0 : index
    %17 = vector.load %arg8[%c0_14, %c0_15, %c0_16] : memref<1x8x32xbf16, #tpu.memory_space<vmem>>, vector<1x8x32xbf16>
    %18 = vector.shape_cast %17 : vector<1x8x32xbf16> to vector<8x32xbf16>
    %19 = vector.shape_cast %16 : vector<8x32xbf16> to vector<1x8x32xbf16>
    tpu.vector_store %arg8[%c0_14, %c0_15, %c0_16], %19 {strides = array<i32>} : memref<1x8x32xbf16, #tpu.memory_space<vmem>>, vector<1x8x32xbf16>,
    %20 = arith.truncf %15 : vector<8x32xf32> to vector<8x32xbf16>
    %c0_17 = arith.constant 0 : index
    %c0_18 = arith.constant 0 : index
    %c0_19 = arith.constant 0 : index
    %21 = vector.load %arg9[%c0_17, %c0_18, %c0_19] : memref<1x8x32xbf16, #tpu.memory_space<vmem>>, vector<1x8x32xbf16>
    %22 = vector.shape_cast %21 : vector<1x8x32xbf16> to vector<8x32xbf16>
    %23 = vector.shape_cast %20 : vector<8x32xbf16> to vector<1x8x32xbf16>
    tpu.vector_store %arg9[%c0_17, %c0_18, %c0_19], %23 {strides = array<i32>} : memref<1x8x32xbf16, #tpu.memory_space<vmem>>, vector<1x8x32xbf16>,
    return
  }
  func.func @transform_0(%arg0: i32, %arg1: i32) -> (i32, i32, i32) {
    %c0_i32 = arith.constant 0 : i32
    %c0_i32_0 = arith.constant 0 : i32
    return %arg0, %arg1, %c0_i32 : i32, i32, i32
  }
  func.func @transform_1(%arg0: i32, %arg1: i32) -> (i32, i32, i32) {
    %c0_i32 = arith.constant 0 : i32
    %c0_i32_0 = arith.constant 0 : i32
    return %arg0, %arg1, %c0_i32 : i32, i32, i32
  }
  func.func @transform_2(%arg0: i32, %arg1: i32) -> (i32, i32) {
    %c0_i32 = arith.constant 0 : i32
    %c0_i32_0 = arith.constant 0 : i32
    %c0_i32_1 = arith.constant 0 : i32
    return %c0_i32, %c0_i32_0 : i32, i32
  }
  func.func @transform_3(%arg0: i32, %arg1: i32) -> (i32, i32) {
    %c0_i32 = arith.constant 0 : i32
    %c0_i32_0 = arith.constant 0 : i32
    %c0_i32_1 = arith.constant 0 : i32
    return %c0_i32, %c0_i32_0 : i32, i32
  }
  func.func @transform_4(%arg0: i32, %arg1: i32) -> (i32, i32) {
    %c0_i32 = arith.constant 0 : i32
    %c0_i32_0 = arith.constant 0 : i32
    %c0_i32_1 = arith.constant 0 : i32
    return %c0_i32, %c0_i32_0 : i32, i32
  }
  func.func @transform_5(%arg0: i32, %arg1: i32) -> (i32, i32) {
    %c0_i32 = arith.constant 0 : i32
    %c0_i32_0 = arith.constant 0 : i32
    %c0_i32_1 = arith.constant 0 : i32
    return %c0_i32, %c0_i32_0 : i32, i32
  }
  func.func @transform_6(%arg0: i32, %arg1: i32) -> (i32, i32, i32) {
    %c0_i32 = arith.constant 0 : i32
    %c0_i32_0 = arith.constant 0 : i32
    return %arg0, %arg1, %c0_i32 : i32, i32, i32
  }
  func.func @transform_7(%arg0: i32, %arg1: i32) -> (i32, i32, i32) {
    %c0_i32 = arith.constant 0 : i32
    %c0_i32_0 = arith.constant 0 : i32
    return %arg0, %arg1, %c0_i32 : i32, i32, i32
  }
}

</mosaic_0001>

<bundles_post_ra>
// kernel: tpu_custom_call.1
= control target key start
LH: loop header
LB: loop body
LE: loop exit
PB: predicated region body
PF: predicated region fallthrough
CT: control target
= control target key end

     0   :  { %s1409_s0 = inlined_call_operand.hbm [shape: f32[2,8,32], index: 0, kind: input, shape index: {}]   ;;  %s1410_s1 = inlined_call_operand.hbm [shape: f32[2,8,32], index: 1, kind: input, shape index: {}]   ;;  %s1411_s2 = inlined_call_operand.hbm [shape: bf16[32,32], index: 2, kind: input, shape index: {}]   ;;  %s1412_s3 = inlined_call_operand.vmem [shape: f32[1,32], index: 3, kind: input, shape index: {}]   ;;  %s1413_s4 = inlined_call_operand.hbm [shape: bf16[32,32], index: 4, kind: input, shape index: {}]   ;;  %s1414_s5 = inlined_call_operand.vmem [shape: f32[1,32], index: 5, kind: input, shape index: {}]   ;;  %s1415_s6 = inlined_call_operand.hbm [shape: bf16[2,8,32], index: 6, kind: output, shape index: {0}]   ;;  %s1416_s7 = inlined_call_operand.hbm [shape: bf16[2,8,32], index: 7, kind: output, shape index: {1}]  }
   0x1   :  { %1419 = sst [smem:[#allocation20_spill]] %s1409_s0 }
   0x2   :  { %1420 = sst [smem:[#allocation21_spill]] %s1410_s1 }
   0x3   :  { %1421 = sst [smem:[#allocation22_spill]] %s1411_s2 }
   0x4   :  { %1422 = sst [smem:[#allocation23_spill]] %s1413_s4 }
   0x5   :  { %13 = vsyncpa [#allocation3], 0 }
   0x6   :  { %15 = vsyncpa [#allocation3 + $0x1], 0 }
   0x7   :  { %16 = vsyncpa [#allocation6], 0 }
   0x8   :  { %18 = vsyncpa [#allocation6 + $0x1], 0 }
   0x9   :  { %19 = vsyncpa [#allocation9], 0 }
   0xa   :  { %20 = vsyncpa [#allocation4], 0 }
   0xb   :  { %22 = vsyncpa [#allocation4 + $0x1], 0 }
   0xc   :  { %23 = vsyncpa [#allocation12], 0 }
   0xd   :  { %25 = vsyncpa [#allocation12 + $0x1], 0  ;;  %s1162_s24 = smov 0   ;;  %s1164_s25 = smov 0  }
   0xe   :  { %s1166_s26 = smov 0   ;;  %s1168_s27 = smov 0  }
   0xf   :  { %s1170_s28 = smov 0   ;;  %s1172_s29 = smov 0  }
  0x10 LB: > { %s1193_s30 = sadd.s32 4294967295, %s1110_s29   ;;  %s727_s8 = sadd.s32 4294967294, %s1110_s29   ;;  %s1110_s29 = sphi %s1172_s29, %s31_s29   ;;  %s1106_s28 = sphi %s1170_s28, %s1446_s28   ;;  %s1102_s27 = sphi %s1168_s27, %s1445_s27   ;;  %s1098_s26 = sphi %s1166_s26, %s1444_s26   ;;  %s1094_s25 = sphi %s1164_s25, %s1443_s25   ;;  %s1090_s24 = sphi %s1162_s24, %s1442_s24  }
  0x11   : > { %p65_p0 = scmp.ne.s32.totalorder %s1094_s25, %s1090_s24  ;;  %p1417_p1 = scmp.eq.s32.totalorder %s1193_s30, 0 }
  0x12   : > { %p209_p3 = scmp.eq.s32.totalorder %s727_s8, 1  ;;  %p728_p5 = scmp.ge.s32.totalorder %s1110_s29, 1 }
  0x13   : > { %p1202_p4 = por %p1417_p1, %p65_p0  ;;  %p244_p7 = scmp.lt.s32.totalorder %s1110_s29, 3 }
  0x14   : > { %p1207_p6 = por %p209_p3, %p65_p0  ;;  %s1112_s12 = smov [#allocation7]  }
  0x15   : > { %p1212_p8 = pnand %p728_p5, %p244_p7  ;;  %s256_s13 = sshll.u32 %s1112_s12, 4  ;;  %s257_s13 = int_to_ptr.vmem [resolvable:$true] %s256_s13 }
  0x16   : > { %s1424_s10 = scalar_select %p1207_p6, 1, 0 }
  0x17   : > { %p795_p9 = pneg %p1212_p8  ;;  %s1113_s15 = smov [#allocation8]  }
  0x18   : > { %s272_s16 = sshll.u32 %s1113_s15, 4  ;;  %s891_s17 = scalar_lea.vmem %s257_s13, 256  ;;  %s273_s16 = int_to_ptr.vmem [resolvable:$true] %s272_s16 }
  0x19   : > { %p1221_p11 = pnand %p795_p9, %p1417_p1  ;;  %p892_p13 = scmp.ne.s32.totalorder %s257_s13, %s891_s17 }
  0x1a   : > { %p899_p5 = scmp.lt.s32.totalorder %s257_s13, %s257_s13  ;;  %p900_p7 = scmp.lt.s32.totalorder %s891_s17, %s891_s17 }
  0x1b   : > { %p882_p12 = pneg %p1221_p11 }
  0x1c   : > { %p901_p10 = por %p900_p7, %p899_p5 }
  0x1d   : > { %p894_p0 = pnand %p892_p13, %p882_p12 }
  0x1f   : > { %p895_p3 = pneg %p894_p0 }
  0x21   : > { %p902_p9 = pnand %p901_p10, %p895_p3 }
  0x23   : > { %905 = shalt.err (!%p902_p9)
}
  0x24   : > { %s1114_s18 = smov 64   ;;  %s1115_s19 = smov 4  }
  0x25   : > { %s1427_s2 = sld [smem:[#allocation22_spill]]  ;;  %s917_s22 = scalar_lea.vmem %s273_s16, 256 }
  0x26   : > { %p918_p1 = scmp.ne.s32.totalorder %s273_s16, %s917_s22  ;;  %p925_p2 = scmp.lt.s32.totalorder %s273_s16, %s273_s16 }
  0x27   : > { %p926_p6 = scmp.lt.s32.totalorder %s917_s22, %s917_s22 }
  0x28   : > { %p920_p13 = pnand %p918_p1, %p882_p12 }
  0x29   : > { %p927_p5 = por %p926_p6, %p925_p2 }
  0x2a   : > { %p921_p0 = pneg %p920_p13 }
  0x2b   : > { %798 = dma.hbm_to_vmem [thread:$0]  (!%p1221_p11), %s1427_s2, 256, %s257_s13, [#allocation6], %s1114_s18, %s1114_s18, %s1115_s19  }
  0x2c   : > { %p928_p10 = pnand %p927_p5, %p921_p0 }
  0x2e   : > { %931 = shalt.err (!%p928_p10)
}
  0x2f   : > { %s1428_s4 = sld [smem:[#allocation23_spill]]  ;;  %s43_s12 = sadd.s32 1, %s1106_s28 }
  0x30   : > { %s52_s13 = sadd.s32 1, %s1098_s26  ;;  %p45_p1 = scmp.ge.s32.totalorder %s43_s12, 2 }
  0x31   : > { %p59_p2 = scmp.ne.s32.totalorder %s1098_s26, %s1094_s25  ;;  %p60_p6 = scmp.eq.s32.totalorder %s1110_s29, 0 }
  0x32   : > { %p818_p12 = scmp.lt.s32.totalorder %s1110_s29, 2  ;;  %s1448_s12 = smov (%p45_p1, %s43_s12), 0 }
  0x33   : > { %1429 = sst [smem:[#allocation19_spill]] %s1448_s12  ;;  %p61_p3 = por %p60_p6, %p59_p2 }
  0x34   : > { %p1430_p7 = scmp.eq.s32.totalorder %s1193_s30, 1  ;;  %s47_s15 = ssub.s32 %s1106_s28, %s1448_s12 }
  0x35   : > { %801 = dma.hbm_to_vmem [thread:$0]  (!%p1221_p11), %s1428_s4, 256, %s273_s16, [#allocation9], %s1114_s18, %s1114_s18, %s1115_s19  }
  0x36   : > { %p1253_p9 = por %p1430_p7, %p59_p2  ;;  %s289_s17 = sand.u32 1, %s1098_s26  }
  0x37   : > { %p50_p13 = scmp.eq.s32.totalorder %s47_s15, 0  ;;  %s732_s16 = sshll.u32 %s289_s17, 3 }
  0x38   : > { %s733_s18 = sshll.u32 %s1106_s28, 7  ;;  %s1432_s0 = sld [smem:[#allocation20_spill]] }
  0x39   : > { %s1262_s19 = scalar_select %p50_p13, %s1098_s26, %s52_s13  }
  0x3a   : > { %s293_s23 = scalar_lea.vmem [#allocation2], %s732_s16  ;;  %p1269_p11 = pnand %p818_p12, %p61_p3 }
  0x3b   : > { %s301_s8 = sshll.u32 %s293_s23, 4  ;;  %s1434_s1 = sld [smem:[#allocation21_spill]]  ;;  %s302_s8 = int_to_ptr.vmem [resolvable:$true] %s301_s8 }
  0x3c   : > { %s290_s13 = scalar_lea.sflag [#allocation3], %s289_s17  ;;  %p934_p0 = pneg %p1269_p11 }
  0x3d   : > { %s945_s20 = scalar_lea.vmem %s302_s8, 128  ;;  %s1116_s21 = smov [#allocation2]  }
  0x3e   : > { %s299_s22 = scalar_lea.hbm %s1432_s0, %s733_s18  ;;  %p946_p5 = scmp.ne.s32.totalorder %s302_s8, %s945_s20 }
  0x3f   : > { %s950_s23 = sshll.u32 %s1116_s21, 4  ;;  %s951_s23 = int_to_ptr.vmem [resolvable:$false] %s950_s23 }
  0x40   : > { %p948_p10 = pnand %p946_p5, %p934_p0  ;;  %s952_s0 = scalar_lea.vmem %s951_s23, 256 }
  0x41   : > { %s1276_s12 = scalar_lea.hbm %s1434_s1, %s733_s18  ;;  %p953_p2 = scmp.lt.s32.totalorder %s302_s8, %s951_s23 }
  0x42   : > { %p949_p1 = pneg %p948_p10  ;;  %p954_p6 = scmp.lt.s32.totalorder %s952_s0, %s945_s20 }
  0x44   : > { %p955_p12 = por %p954_p6, %p953_p2 }
  0x46   : > { %p956_p3 = pnand %p955_p12, %p949_p1 }
  0x48   : > { %959 = shalt.err (!%p956_p3)
}
  0x49   : > { %805 = dma.hbm_to_vmem [thread:$0]  (!%p1269_p11), %s299_s22, 128, %s302_s8, %s290_s13  }
  0x4a   : > { %s308_s4 = sand.u32 1, %s1110_s29   ;;  %s312_s17 = scalar_lea.vmem [#allocation5], %s732_s16 }
  0x4b   : > { %s320_s18 = sshll.u32 %s312_s17, 4  ;;  %s309_s15 = scalar_lea.sflag [#allocation6], %s308_s4  ;;  %s321_s18 = int_to_ptr.vmem [resolvable:$true] %s320_s18 }
  0x4c   : > { %s973_s1 = scalar_lea.vmem %s321_s18, 128  ;;  %s1117_s0 = smov [#allocation5]  }
  0x4d   : > { %p974_p7 = scmp.ne.s32.totalorder %s321_s18, %s973_s1  ;;  %s978_s20 = sshll.u32 %s1117_s0, 4  ;;  %s979_s20 = int_to_ptr.vmem [resolvable:$false] %s978_s20 }
  0x4e   : > { %s980_s21 = scalar_lea.vmem %s979_s20, 256  ;;  %p981_p10 = scmp.lt.s32.totalorder %s321_s18, %s979_s20 }
  0x4f   : > { %p976_p13 = pnand %p974_p7, %p934_p0  ;;  %p982_p1 = scmp.lt.s32.totalorder %s980_s21, %s973_s1 }
  0x51   : > { %p977_p5 = pneg %p976_p13  ;;  %p983_p2 = por %p982_p1, %p981_p10 }
  0x53   : > { %p984_p6 = pnand %p983_p2, %p977_p5 }
  0x55   : > { %987 = shalt.err (!%p984_p6)
}
  0x56   : > { %808 = dma.hbm_to_vmem [thread:$0]  (!%p1269_p11), %s1276_s12, 128, %s321_s18, %s309_s15  }
  0x57   : > { %329 = sbr.rel (%p1212_p8) target bundleno = 345 (0x159), region = 44  ;;  %s1295_s16 = sand.u32 (!%p1212_p8), 1, %s1094_s25  }
  0x58   : > { %s737_s22 = sshll.u32 (!%p1212_p8), %s1295_s16, 3  ;;  %s332_s8 = scalar_lea.sflag (!%p1212_p8), [#allocation3], %s1295_s16 }
  0x59   : > { %s335_s13 = scalar_lea.vmem (!%p1212_p8), [#allocation2], %s737_s22 }
  0x5c   : > { %1065 = dma.done.wait (%p1202_p4), %s332_s8, 128  }
  0x5d   : > { %1067 = vsyncadd (%p1202_p4), %s332_s8, 4294967168  ;;  %s340_s1 = sand.u32 1, %s1193_s30   ;;  %s344_s11 = scalar_lea.vmem [#allocation5], %s737_s22 }
  0x5e   : > { %s341_s2 = scalar_lea.sflag [#allocation6], %s340_s1 }
  0x5f   : > { %1069 = dma.done.wait (%p1202_p4), %s341_s2, 128  }
  0x60   : > { %1071 = vsyncadd (%p1202_p4), %s341_s2, 4294967168  ;;  %p1435_p8 = scmp.eq.s32.totalorder %s1193_s30, 0 }
  0x62   : > { %1073 = dma.done.wait (%p1435_p8), [#allocation6], 256   ;;  %p1436_p11 = pmov %p1435_p8 }
  0x63   : > { %p1437_p0 = pmov %p1435_p8 }
  0x64   : > { %1075 = vsyncadd (%p1436_p11), [#allocation6], 4294967040 }
  0x65   : > { %1077 = dma.done.wait (%p1437_p0), [#allocation9], 256   ;;  %p1438_p12 = pmov %p1437_p0 }
  0x66   : > { %v1118_v0 = vmov 0.0   ;;  %vm1119_vm0 = vmmov 0   ;;  %v876_v1 = vld [vmem:[#allocation7 + $0x8] sm:$0xff]   ;;  %v877_v2 = vld [vmem:[#allocation8 + $0x8] sm:$0xff]   ;;  %v878_v3 = vld [vmem:[#allocation7] sm:$0xff]   ;;  %vm421_vm1 = vcmask 261120  }
  0x67   : > { %1079 = vsyncadd (%p1438_p12), [#allocation9], 4294967040  ;;  %763 = vmatprep.subr.bf16.mxu0 %v1118_v0  ;;  %771 = vmatprep.subr.bf16.mxu1 %v1118_v0  ;;  %v879_v4 = vld [vmem:[#allocation8] sm:$0xff]   ;;  %v394_v5 = vld [vmem:[%s335_s13] sm:$0xff]  ;;  %s741_s30 = sshll.u32 %s1295_s16, 2  ;;  %s753_s17 = sshll.u32 %s1102_s27, 6 }
  0x68   : > { %767 = vmatprep.mubr.msk.bf16.mxu0 %vm1119_vm0, %v1118_v0  ;;  %775 = vmatprep.mubr.msk.bf16.mxu1 %vm1119_vm0, %v1118_v0  ;;  %v396_v6 = vld [vmem:[%s344_s11] sm:$0xff]  ;;  %v395_v7 = vpack.c.bf16 %v394_v5, %v394_v5  ;;  %v743_v9 = vld [vmem:[%s1412_s3] ss:$0 sm:$0xff]  ;;  %s385_s18 = scalar_lea.vmem [#allocation10], %s741_s30  ;;  %s1324_s0 = scalar_lea.vmem [#allocation11], %s741_s30  ;;  %vm532_vm2 = vcmask 257024  }
  0x69   : > { %764 = vmatpush3.bf16.msra.mxu0 %v876_v1  ;;  %772 = vmatpush3.bf16.msra.mxu1 %v877_v2  ;;  %v397_v8 = vpack.c.bf16 %v396_v6, %v396_v6  ;;  %v747_v10 = vld [vmem:[%s1414_s5] ss:$0 sm:$0xff]  ;;  %s556_s15 = sshll.u32 %s385_s18, 4  ;;  %s570_s20 = sshll.u32 %s1324_s0, 4  ;;  %s1332_s15 = int_to_ptr.vmem [resolvable:$true] %s556_s15  ;;  %s1339_s20 = int_to_ptr.vmem [resolvable:$true] %s570_s20 }
  0x6a   : > { %765 = vmatprep.subr.bf16.mxu0 %v1118_v0  ;;  %773 = vmatprep.subr.bf16.mxu1 %v1118_v0  ;;  %s1330_s8 = scalar_lea.hbm %s1415_s6, %s753_s17  ;;  %s1337_s1 = scalar_lea.hbm %s1416_s7, %s753_s17 }
  0x6b   : > { %s537_s2 = scalar_lea.sflag [#allocation4], %s1295_s16  ;;  %s988_s11 = scalar_lea.vmem %s1332_s15, 64 }
  0x6c   : > { %p989_p4 = scmp.ne.s32.totalorder %s1332_s15, %s988_s11  ;;  %s1120_s30 = smov [#allocation10]  }
  0x6d   : > { %766 = vmatpush3.bf16.msra.mxu0 %v878_v3  ;;  %774 = vmatpush3.bf16.msra.mxu1 %v879_v4  ;;  %s992_s9 = sshll.u32 %s1120_s30, 4  ;;  %s993_s9 = int_to_ptr.vmem [resolvable:$false] %s992_s9 }
  0x6e   : > { %p990_p3 = pnand %p989_p4, %p1253_p9  ;;  %s994_s12 = scalar_lea.vmem %s993_s9, 128 }
  0x6f   : > { %p995_p13 = scmp.lt.s32.totalorder %s1332_s15, %s993_s9  ;;  %p996_p5 = scmp.lt.s32.totalorder %s994_s12, %s988_s11 }
  0x70   : > { %768 = vmatmul.mubr.msk.bf16.vlgmr.msra.gmra.mxu0 %vm421_vm1, %v395_v7  ;;  %776 = vmatmul.mubr.msk.bf16.vlgmr.msra.gmra.mxu1 %vm421_vm1, %v397_v8  ;;  %p991_p7 = pneg %p990_p3 }
  0x71   : > { %p997_p10 = por %p996_p5, %p995_p13 }
  0x73   : > { %p998_p1 = pnand %p997_p10, %p991_p7 }
 0x130   : > { %v459_v11 = vpop.f32.mrf.mxu0  ;;  %v525_v13 = vpop.f32.mrf.mxu1 }
 0x131   : > { %v460_v12 = vadd.f32 %v743_v9, %v459_v11  ;;  %v526_v14 = vadd.f32 %v747_v10, %v525_v13 }
 0x132   : > { %v769_v15 = vpop.f32.mrf.mxu0  ;;  %v777_v17 = vpop.f32.mrf.mxu1 }
 0x133   : > { %v531_v16 = vpack.c.bf16 %v460_v12, %v460_v12  ;;  %v534_v18 = vpack.c.bf16 %v526_v14, %v526_v14 }
 0x134   : > { %v462_v19 = vpop.f32.mrf.mxu0  ;;  %v528_v20 = vpop.f32.mrf.mxu1 }
 0x135   : > { %533 = vst.msk [vmem:[%s385_s18] sm:$0xf] %vm532_vm2, %v531_v16 }
 0x136   : > { %v770_v21 = vpop.f32.mrf.mxu0 }
 0x137   : > { %1001 = shalt.err (!%p998_p1)
}
 0x138   : > { %s1002_s23 = scalar_lea.hbm %s1330_s8, 64  ;;  %s1006_s18 = scalar_lea.hbm %s1415_s6, 128 }
 0x139   : > { %p1003_p2 = scmp.ne.s32.totalorder %s1330_s8, %s1002_s23  ;;  %p1007_p11 = scmp.lt.s32.totalorder %s1330_s8, %s1415_s6 }
 0x13a   : > { %p1008_p0 = scmp.lt.s32.totalorder %s1006_s18, %s1002_s23 }
 0x13b   : > { %p1004_p6 = pnand %p1003_p2, %p1253_p9 }
 0x13c   : > { %p1009_p12 = por %p1008_p0, %p1007_p11 }
 0x13d   : > { %p1005_p8 = pneg %p1004_p6 }
 0x13f   : > { %p1010_p4 = pnand %p1009_p12, %p1005_p8 }
 0x141   : > { %1013 = shalt.err (!%p1010_p4)
}
 0x142   : > { %791 = dma.vmem_to_hbm [thread:$0]  (%p1253_p9), %s1332_s15, 64, %s1330_s8, %s537_s2   ;;  %535 = vst.msk [vmem:[%s1324_s0] sm:$0xf] %vm532_vm2, %v534_v18  ;;  %v778_v22 = vpop.f32.mrf.mxu1 }
 0x143   : > { %s542_s27 = scalar_lea.sflag [#allocation12], %s1295_s16  ;;  %s1014_s13 = scalar_lea.vmem %s1339_s20, 64 }
 0x144   : > { %p1015_p3 = scmp.ne.s32.totalorder %s1339_s20, %s1014_s13  ;;  %s1121_s11 = smov [#allocation11]  }
 0x145   : > { %s1018_s30 = sshll.u32 %s1121_s11, 4  ;;  %s1019_s30 = int_to_ptr.vmem [resolvable:$false] %s1018_s30 }
 0x146   : > { %p1016_p7 = pnand %p1015_p3, %p1253_p9  ;;  %s1020_s9 = scalar_lea.vmem %s1019_s30, 128 }
 0x147   : > { %p1021_p5 = scmp.lt.s32.totalorder %s1339_s20, %s1019_s30  ;;  %p1022_p10 = scmp.lt.s32.totalorder %s1020_s9, %s1014_s13 }
 0x148   : > { %p1017_p13 = pneg %p1016_p7 }
 0x149   : > { %p1023_p1 = por %p1022_p10, %p1021_p5 }
 0x14b   : > { %p1024_p2 = pnand %p1023_p1, %p1017_p13 }
 0x14d   : > { %1027 = shalt.err (!%p1024_p2)
}
 0x14e   : > { %s1028_s15 = scalar_lea.hbm %s1337_s1, 64  ;;  %s1032_s8 = scalar_lea.hbm %s1416_s7, 128 }
 0x14f   : > { %p1029_p6 = scmp.ne.s32.totalorder %s1337_s1, %s1028_s15  ;;  %p1033_p0 = scmp.lt.s32.totalorder %s1337_s1, %s1416_s7 }
 0x150   : > { %p1034_p12 = scmp.lt.s32.totalorder %s1032_s8, %s1028_s15 }
 0x151   : > { %p1030_p8 = pnand %p1029_p6, %p1253_p9 }
 0x152   : > { %p1035_p4 = por %p1034_p12, %p1033_p0 }
 0x153   : > { %p1031_p11 = pneg %p1030_p8 }
 0x155   : > { %p1036_p3 = pnand %p1035_p4, %p1031_p11 }
 0x157   : > { %1039 = shalt.err (!%p1036_p3)
}
 0x158   : > { %792 = dma.vmem_to_hbm [thread:$0]  (%p1253_p9), %s1339_s20, 64, %s1337_s1, %s542_s27  }
 0x159 PF: > { %s582_s23 = sand.u32 1, %s1090_s24   ;;  %p1439_p7 = scmp.ne.s32.totalorder %s1424_s10, 0 }
 0x15a   : > { %p1440_p13 = scmp.ge.s32.totalorder %s1110_s29, 2  ;;  %s583_s4 = scalar_lea.sflag [#allocation4], %s582_s23 }
 0x15c   : > { %p810_p5 = pnand %p1440_p13, %p1439_p7 }
 0x15e   : > { %p811_p10 = pneg %p810_p5 }
 0x160   : > { %1081 = dma.done.wait (%p811_p10), %s583_s4, 64  }
 0x161   : > { %1083 = vsyncadd (%p811_p10), %s583_s4, 4294967232  ;;  %s592_s17 = scalar_lea.sflag [#allocation12], %s582_s23 }
 0x162   : > { %1085 = dma.done.wait (%p811_p10), %s592_s17, 64  }
 0x163   : > { %1087 = vsyncadd (%p811_p10), %s592_s17, 4294967232  ;;  %s31_s29 = sadd.s32 1, %s1110_s29   ;;  %s1441_s14 = sld [smem:[#allocation19_spill]] }
 0x164   : > { %p28_p1 = scmp.ge.s32.totalorder %s31_s29, 4   ;;  %s1442_s24 = smov %s1094_s25 }
 0x165   : > { %s1443_s25 = smov %s1098_s26  ;;  %s1444_s26 = smov %s1262_s19 }
 0x166   : > { %s1445_s27 = smov %s1106_s28  ;;  %30 = sbr.rel (!%p28_p1) target bundleno = 16 (0x10), region = 127 }
 0x169   : > { %s1446_s28 = smov %s1441_s14 }
 0x16b   :  { %597 = vsyncpa [#allocation3], 1 }
 0x16c   :  { %599 = vsyncpa [#allocation3 + $0x1], 1 }
 0x16d   :  { %600 = vsyncpa [#allocation6], 1 }
 0x16e   :  { %602 = vsyncpa [#allocation6 + $0x1], 1 }
 0x16f   :  { %603 = vsyncpa [#allocation9], 1 }
 0x170   :  { %604 = vsyncpa [#allocation4], 1 }
 0x171   :  { %606 = vsyncpa [#allocation4 + $0x1], 1 }
 0x172   :  { %607 = vsyncpa [#allocation12], 1 }
 0x173   :  { %609 = vsyncpa [#allocation12 + $0x1], 1 }

</bundles_post_ra>
